<compile_context>
chip_gen: v7x
topology: tpu7x:2x2x1
jax: 0.10.0
libtpu: 0.0.40
codegen_flags: <defaults>
</compile_context>

<pallas_src>
import jax
import jax.numpy as jnp
from jax.experimental import pallas as pl
from jax.experimental.pallas import tpu as pltpu


def _round_up(x, m):
    return (x + m - 1) // m * m


def bottle_classifier_kernel(x_ref, w1_ref, b1_ref, w2_ref, b2_ref, o_ref):
    # Bottleneck linear (BN already folded into w1/b1): bf16 operands, f32 acc.
    h = jnp.dot(x_ref[...], w1_ref[...], preferred_element_type=jnp.float32)
    h = h + b1_ref[...]
    # LeakyReLU(0.1) in f32 (v5e VPU has no bf16).
    h = jnp.where(h >= 0, h, 0.1 * h)
    # Dropout(p=0.5) is identity in eval mode.
    # Classifier linear: cast the intermediate to bf16 only for the MXU feed.
    out = jnp.dot(h.astype(w2_ref.dtype), w2_ref[...],
                  preferred_element_type=jnp.float32)
    o_ref[...] = (out + b2_ref[...]).astype(o_ref.dtype)


def bottle_classifier(x, w1, b1, gamma, beta, run_mean, run_var, w2, b2,
                      eps=1e-5):
    B, in_dim = x.shape
    bottle_dim = w1.shape[1]
    out_dim = w2.shape[1]

    # --- Fold BatchNorm1d (eval) into the first Linear (plain-JAX glue). ---
    scale = gamma / jnp.sqrt(run_var + eps)          # (1, bottle_dim)
    shift = beta - run_mean * scale                  # (1, bottle_dim)
    w1f = w1 * scale                                 # scale per output column
    b1f = b1 * scale + shift

    # --- Pad everything to lane-dense (multiple-of-128) feature dims. ---
    in_pad = _round_up(in_dim, 128)
    bottle_pad = _round_up(bottle_dim, 128)
    out_pad = _round_up(out_dim, 128)

    # --- Batch tiling: single step for small B, 256-row tiles otherwise. ---
    B_pad = _round_up(B, 8)
    if B_pad <= 256:
        TB = B_pad
    else:
        TB = 256
        B_pad = _round_up(B_pad, TB)

    # Zero padding is numerically exact (padded K-rows/cols contribute 0).
    x_p = jnp.pad(x, ((0, B_pad - B), (0, in_pad - in_dim))
                  ).astype(jnp.bfloat16)
    w1_p = jnp.pad(w1f, ((0, in_pad - in_dim), (0, bottle_pad - bottle_dim))
                   ).astype(jnp.bfloat16)
    b1_p = jnp.pad(b1f, ((0, 0), (0, bottle_pad - bottle_dim))
                   ).astype(jnp.float32)
    w2_p = jnp.pad(w2, ((0, bottle_pad - bottle_dim), (0, out_pad - out_dim))
                   ).astype(jnp.bfloat16)
    b2_p = jnp.pad(b2, ((0, 0), (0, out_pad - out_dim))).astype(jnp.float32)

    grid = (B_pad // TB,)

    out = pl.pallas_call(
        bottle_classifier_kernel,
        out_shape=jax.ShapeDtypeStruct((B_pad, out_pad), jnp.float32),
        grid=grid,
        in_specs=[
            # Activations: tiled over batch (double-buffered by the pipeline).
            pl.BlockSpec((TB, in_pad), lambda i: (i, 0)),
            # Weights / biases: constant block index => fetched once, resident.
            pl.BlockSpec((in_pad, bottle_pad), lambda i: (0, 0)),
            pl.BlockSpec((1, bottle_pad), lambda i: (0, 0)),
            pl.BlockSpec((bottle_pad, out_pad), lambda i: (0, 0)),
            pl.BlockSpec((1, out_pad), lambda i: (0, 0)),
        ],
        out_specs=pl.BlockSpec((TB, out_pad), lambda i: (i, 0)),
        compiler_params=pltpu.CompilerParams(
            dimension_semantics=("parallel",)),
    )(x_p, w1_p, b1_p, w2_p, b2_p)

    return out[:B, :out_dim]


def init_params(key, in_dim, bottle_dim, out_dim):
    k1, k2, k3 = jax.random.split(key, 3)
    # Linear1: kaiming_normal, mode='fan_out' (fan_out = bottle_dim), a=0
    std1 = (2.0 / bottle_dim) ** 0.5
    w1 = std1 * jax.random.normal(k1, (in_dim, bottle_dim), jnp.float32)
    b1 = jnp.zeros((1, bottle_dim), jnp.float32)
    # BatchNorm1d: weight ~ N(1, 0.02), bias = 0, running mean=0, var=1
    gamma = 1.0 + 0.02 * jax.random.normal(k2, (1, bottle_dim), jnp.float32)
    beta = jnp.zeros((1, bottle_dim), jnp.float32)
    run_mean = jnp.zeros((1, bottle_dim), jnp.float32)
    run_var = jnp.ones((1, bottle_dim), jnp.float32)
    # Classifier Linear: weight ~ N(0, 0.001), bias = 0
    w2 = 0.001 * jax.random.normal(k3, (bottle_dim, out_dim), jnp.float32)
    b2 = jnp.zeros((1, out_dim), jnp.float32)
    return w1, b1, gamma, beta, run_mean, run_var, w2, b2


if __name__ == "__main__":
    B, in_dim, bottle_dim, out_dim = 8, 64, 512, 16

    key = jax.random.PRNGKey(0)
    kx, kp = jax.random.split(key)
    x = jax.random.normal(kx, (B, in_dim), jnp.float32)
    params = init_params(kp, in_dim, bottle_dim, out_dim)

    out = bottle_classifier(x, *params)
    jax.block_until_ready(out)

    # Pure-JAX f32 reference (eval-mode math). The kernel uses bf16 MXU
    # operands with f32 accumulation, so allow a small tolerance.
    w1, b1, gamma, beta, rm, rv, w2, b2 = params
    h = x @ w1 + b1
    h = (h - rm) / jnp.sqrt(rv + 1e-5) * gamma + beta
    h = jnp.where(h >= 0, h, 0.1 * h)
    ref = h @ w2 + b2

    assert out.shape == (B, out_dim)
    assert jnp.allclose(out, ref, atol=2e-3, rtol=2e-2), (
        float(jnp.max(jnp.abs(out - ref))))

    print("KERNEL_OK")
</pallas_src>

<mosaic_0001>
module attributes {stable_mosaic.version = 11 : i64} {
  func.func @bottle_classifier_kernel(%arg0: i32, %arg1: memref<8x128xbf16, #tpu.memory_space<vmem>>, %arg2: memref<128x512xbf16, #tpu.memory_space<vmem>>, %arg3: memref<1x512xf32, #tpu.memory_space<vmem>>, %arg4: memref<512x128xbf16, #tpu.memory_space<vmem>>, %arg5: memref<1x128xf32, #tpu.memory_space<vmem>>, %arg6: memref<8x128xf32, #tpu.memory_space<vmem>>) attributes {dimension_semantics = [#tpu.dimension_semantics<parallel>], iteration_bounds = array<i64: 1>, scalar_prefetch = 0 : i64, scratch_operands = 0 : i64, tpu.core_type = #tpu.core_type<tc>, window_params = [{transform_indices = @transform_0, window_bounds = array<i64: 8, 128>}, {pipeline_mode = #tpu.pipeline_mode<synchronous>, transform_indices = @transform_1, window_bounds = array<i64: 128, 512>}, {pipeline_mode = #tpu.pipeline_mode<synchronous>, transform_indices = @transform_2, window_bounds = array<i64: 1, 512>}, {pipeline_mode = #tpu.pipeline_mode<synchronous>, transform_indices = @transform_3, window_bounds = array<i64: 512, 128>}, {pipeline_mode = #tpu.pipeline_mode<synchronous>, transform_indices = @transform_4, window_bounds = array<i64: 1, 128>}, {transform_indices = @transform_5, window_bounds = array<i64: 8, 128>}]} {
    %c0 = arith.constant 0 : index
    %c0_0 = arith.constant 0 : index
    %0 = vector.load %arg1[%c0, %c0_0] : memref<8x128xbf16, #tpu.memory_space<vmem>>, vector<8x128xbf16>
    %c0_1 = arith.constant 0 : index
    %c0_2 = arith.constant 0 : index
    %1 = vector.load %arg2[%c0_1, %c0_2] : memref<128x512xbf16, #tpu.memory_space<vmem>>, vector<128x512xbf16>
    %cst = arith.constant dense<0.000000e+00> : vector<8x512xf32>
    %2 = tpu.matmul %0, %1, %cst {dimension_numbers = #tpu.dot_dimension_numbers<[1], [0], [0], [1], [0, 0, 1, 1], [], []>} : vector<8x128xbf16>, vector<128x512xbf16>, vector<8x512xf32> -> vector<8x512xf32>
    %c0_3 = arith.constant 0 : index
    %c0_4 = arith.constant 0 : index
    %3 = vector.load %arg3[%c0_3, %c0_4] : memref<1x512xf32, #tpu.memory_space<vmem>>, vector<1x512xf32>
    %4 = vector.broadcast %3 : vector<1x512xf32> to vector<8x512xf32>
    %5 = arith.addf %2, %4 : vector<8x512xf32>
    %cst_5 = arith.constant 0.000000e+00 : f32
    %6 = vector.broadcast %cst_5 : f32 to vector<8x512xf32>
    %7 = arith.cmpf oge, %5, %6 : vector<8x512xf32>
    %cst_6 = arith.constant 1.000000e-01 : f32
    %8 = vector.broadcast %cst_6 : f32 to vector<8x512xf32>
    %9 = arith.mulf %8, %5 : vector<8x512xf32>
    %10 = arith.select %7, %5, %9 : vector<8x512xi1>, vector<8x512xf32>
    %11 = arith.truncf %10 : vector<8x512xf32> to vector<8x512xbf16>
    %c0_7 = arith.constant 0 : index
    %c0_8 = arith.constant 0 : index
    %12 = vector.load %arg4[%c0_7, %c0_8] : memref<512x128xbf16, #tpu.memory_space<vmem>>, vector<512x128xbf16>
    %cst_9 = arith.constant dense<0.000000e+00> : vector<8x128xf32>
    %13 = tpu.matmul %11, %12, %cst_9 {dimension_numbers = #tpu.dot_dimension_numbers<[1], [0], [0], [1], [0, 0, 1, 1], [], []>} : vector<8x512xbf16>, vector<512x128xbf16>, vector<8x128xf32> -> vector<8x128xf32>
    %c0_10 = arith.constant 0 : index
    %c0_11 = arith.constant 0 : index
    %14 = vector.load %arg5[%c0_10, %c0_11] : memref<1x128xf32, #tpu.memory_space<vmem>>, vector<1x128xf32>
    %15 = vector.broadcast %14 : vector<1x128xf32> to vector<8x128xf32>
    %16 = arith.addf %13, %15 : vector<8x128xf32>
    %c0_12 = arith.constant 0 : index
    %c0_13 = arith.constant 0 : index
    %17 = vector.load %arg6[%c0_12, %c0_13] : memref<8x128xf32, #tpu.memory_space<vmem>>, vector<8x128xf32>
    tpu.vector_store %arg6[%c0_12, %c0_13], %16 {strides = array<i32>} : memref<8x128xf32, #tpu.memory_space<vmem>>, vector<8x128xf32>,
    return
  }
  func.func @transform_0(%arg0: i32) -> (i32, i32) {
    %c0_i32 = arith.constant 0 : i32
    %c0_i32_0 = arith.constant 0 : i32
    return %arg0, %c0_i32 : i32, i32
  }
  func.func @transform_1(%arg0: i32) -> (i32, i32) {
    %c0_i32 = arith.constant 0 : i32
    %c0_i32_0 = arith.constant 0 : i32
    %c0_i32_1 = arith.constant 0 : i32
    return %c0_i32, %c0_i32_0 : i32, i32
  }
  func.func @transform_2(%arg0: i32) -> (i32, i32) {
    %c0_i32 = arith.constant 0 : i32
    %c0_i32_0 = arith.constant 0 : i32
    %c0_i32_1 = arith.constant 0 : i32
    return %c0_i32, %c0_i32_0 : i32, i32
  }
  func.func @transform_3(%arg0: i32) -> (i32, i32) {
    %c0_i32 = arith.constant 0 : i32
    %c0_i32_0 = arith.constant 0 : i32
    %c0_i32_1 = arith.constant 0 : i32
    return %c0_i32, %c0_i32_0 : i32, i32
  }
  func.func @transform_4(%arg0: i32) -> (i32, i32) {
    %c0_i32 = arith.constant 0 : i32
    %c0_i32_0 = arith.constant 0 : i32
    %c0_i32_1 = arith.constant 0 : i32
    return %c0_i32, %c0_i32_0 : i32, i32
  }
  func.func @transform_5(%arg0: i32) -> (i32, i32) {
    %c0_i32 = arith.constant 0 : i32
    %c0_i32_0 = arith.constant 0 : i32
    return %arg0, %c0_i32 : i32, i32
  }
}

</mosaic_0001>

<bundles_post_ra>
// kernel: tpu_custom_call.1
= control target key start
LH: loop header
LB: loop body
LE: loop exit
PB: predicated region body
PF: predicated region fallthrough
CT: control target
= control target key end

     0   :  { %10 = vsyncpa [#allocation3], 0  ;;  %s1119_s0 = inlined_call_operand.hbm [shape: bf16[8,128], index: 0, kind: input, shape index: {}]   ;;  %s1120_s1 = inlined_call_operand.hbm [shape: bf16[128,512], index: 1, kind: input, shape index: {}]   ;;  %s1121_s2 = inlined_call_operand.vmem [shape: f32[1,512], index: 2, kind: input, shape index: {}]   ;;  %s1122_s3 = inlined_call_operand.hbm [shape: bf16[512,128], index: 3, kind: input, shape index: {}]   ;;  %s1123_s4 = inlined_call_operand.vmem [shape: f32[1,128], index: 4, kind: input, shape index: {}]   ;;  %s1124_s5 = inlined_call_operand.hbm [shape: f32[8,128], index: 5, kind: output, shape index: {}]  }
   0x1   :  { %11 = vsyncpa [#allocation6], 0 }
   0x2   :  { %12 = vsyncpa [#allocation4], 0  ;;  %s1026_s18 = smov [#allocation5]   ;;  %s932_s22 = scalar_lea.hbm %s1120_s1, 4096 }
   0x3   :  { %s28_s19 = sshll.u32 %s1026_s18, 4  ;;  %p933_p0 = scmp.ne.s32.totalorder %s1120_s1, %s932_s22  ;;  %s29_s19 = int_to_ptr.vmem [resolvable:$true] %s28_s19 }
   0x4   :  { %p936_p1 = scmp.lt.u32.totalorder %s932_s22, %s1120_s1 }
   0x6   :  { %p938_p2 = pnand %p936_p1, %p933_p0 }
   0x8   :  { %941 = shalt.err (!%p938_p2)
}
   0x9   :  { %s942_s27 = scalar_lea.vmem %s29_s19, 4096  ;;  %p947_p4 = scmp.lt.s32.totalorder %s29_s19, %s29_s19 }
   0xa   :  { %p943_p3 = scmp.ne.s32.totalorder %s29_s19, %s942_s27  ;;  %p948_p5 = scmp.lt.s32.totalorder %s942_s27, %s942_s27 }
   0xc   :  { %p949_p6 = por %p948_p5, %p947_p4 }
   0xe   :  { %p950_p7 = pnand %p949_p6, %p943_p3 }
  0x10   :  { %953 = shalt.err (!%p950_p7)
}
  0x11   :  { %s1027_s28 = smov 256   ;;  %s1028_s29 = smov 16  }
  0x12   :  { %34 = dma.hbm_to_vmem [thread:$0]  %s1120_s1, 4096, %s29_s19, [#allocation6], %s1027_s28, %s1027_s28, %s1028_s29  }
  0x13   :  { %s1029_s7 = smov [#allocation2]   ;;  %s1030_s9 = smov [#allocation7]  }
  0x14   :  { %s19_s8 = sshll.u32 %s1029_s7, 4  ;;  %s42_s10 = sshll.u32 %s1030_s9, 4  ;;  %s20_s8 = int_to_ptr.vmem [resolvable:$true] %s19_s8  ;;  %s43_s10 = int_to_ptr.vmem [resolvable:$true] %s42_s10 }
  0x15   :  { %s954_s13 = scalar_lea.hbm %s1119_s0, 64 }
  0x16   :  { %p955_p8 = scmp.ne.s32.totalorder %s1119_s0, %s954_s13  ;;  %p958_p9 = scmp.lt.u32.totalorder %s954_s13, %s1119_s0 }
  0x18   :  { %p960_p10 = pnand %p958_p9, %p955_p8 }
  0x1a   :  { %963 = shalt.err (!%p960_p10)
}
  0x1b   :  { %s964_s1 = scalar_lea.vmem %s20_s8, 64  ;;  %p969_p12 = scmp.lt.s32.totalorder %s20_s8, %s20_s8 }
  0x1c   :  { %p965_p11 = scmp.ne.s32.totalorder %s20_s8, %s964_s1  ;;  %p970_p13 = scmp.lt.s32.totalorder %s964_s1, %s964_s1 }
  0x1e   :  { %p971_p0 = por %p970_p13, %p969_p12 }
  0x20   :  { %p972_p1 = pnand %p971_p0, %p965_p11 }
  0x22   :  { %975 = shalt.err (!%p972_p1)
}
  0x23   :  { %22 = dma.hbm_to_vmem [thread:$0]  %s1119_s0, 64, %s20_s8, [#allocation3]  }
  0x24   :  { %s976_s22 = scalar_lea.hbm %s1122_s3, 4096 }
  0x25   :  { %p977_p2 = scmp.ne.s32.totalorder %s1122_s3, %s976_s22  ;;  %p980_p3 = scmp.lt.u32.totalorder %s976_s22, %s1122_s3 }
  0x27   :  { %p982_p4 = pnand %p980_p3, %p977_p2 }
  0x29   :  { %985 = shalt.err (!%p982_p4)
}
  0x2a   :  { %s986_s27 = scalar_lea.vmem %s43_s10, 4096  ;;  %p991_p6 = scmp.lt.s32.totalorder %s43_s10, %s43_s10 }
  0x2b   :  { %p987_p5 = scmp.ne.s32.totalorder %s43_s10, %s986_s27  ;;  %p992_p7 = scmp.lt.s32.totalorder %s986_s27, %s986_s27 }
  0x2d   :  { %p993_p8 = por %p992_p7, %p991_p6 }
  0x2f   :  { %p994_p9 = pnand %p993_p8, %p987_p5 }
  0x31   :  { %997 = shalt.err (!%p994_p9)
}
  0x32   :  { %s1031_s0 = smov 64   ;;  %s1032_s28 = smov 4  }
  0x33   :  { %48 = dma.hbm_to_vmem [thread:$0]  %s1122_s3, 4096, %s43_s10, [#allocation6], %s1031_s0, %s1031_s0, %s1032_s28  }
  0x34   :  { %1020 = dma.done.wait [#allocation3], 64  }
  0x35   :  { %1021 = vsyncadd [#allocation3], 4294967232 }
  0x36   :  { %1022 = dma.done.wait [#allocation6], 8192  }
  0x37   :  { %1023 = vsyncadd [#allocation6], 4294959104  ;;  %v1033_v0 = vmov 0   ;;  %v852_v1 = vld [vmem:[#allocation5 + $0x4] ss:$16 sps:$4 sm:$0xff]   ;;  %v904_v38 = vld [vmem:[#allocation7 + $0x48] sm:$0xff]  }
  0x38   :  { %308 = vmatprep.mubr.bf16.mxu0 %v1033_v0  ;;  %349 = vmatprep.mubr.bf16.mxu1 %v1033_v0  ;;  %v854_v2 = vld [vmem:[#allocation5 + $0xc] ss:$16 sps:$4 sm:$0xff]   ;;  %v856_v3 = vld [vmem:[#allocation5] ss:$16 sps:$4 sm:$0xff]   ;;  %v857_v4 = vld [vmem:[#allocation5 + $0x8] ss:$16 sps:$4 sm:$0xff]  }
  0x39   :  { %276 = vmatprep.subr.bf16.mxu0 %v852_v1  ;;  %317 = vmatprep.subr.bf16.mxu1 %v854_v2  ;;  %v858_v5 = vld [vmem:[#allocation5 + $0x24] ss:$16 sps:$4 sm:$0xff]   ;;  %v860_v6 = vld [vmem:[#allocation5 + $0x2c] ss:$16 sps:$4 sm:$0xff]   ;;  %v862_v7 = vld [vmem:[#allocation5 + $0x20] ss:$16 sps:$4 sm:$0xff]   ;;  %v96_v2 = vlaneseq }
  0x3a   :  { %277 = vmatpush1.bf16.msra.mxu0 %v856_v3  ;;  %318 = vmatpush1.bf16.msra.mxu1 %v857_v4  ;;  %v863_v8 = vld [vmem:[#allocation5 + $0x28] ss:$16 sps:$4 sm:$0xff]   ;;  %v864_v9 = vld [vmem:[#allocation5 + $0x44] ss:$16 sps:$4 sm:$0xff]   ;;  %v866_v10 = vld [vmem:[#allocation5 + $0x4c] ss:$16 sps:$4 sm:$0xff]  }
  0x3b   :  { %278 = vmatprep.subr.bf16.mxu0 %v858_v5  ;;  %319 = vmatprep.subr.bf16.mxu1 %v860_v6  ;;  %v868_v11 = vld [vmem:[#allocation5 + $0x40] ss:$16 sps:$4 sm:$0xff]   ;;  %v869_v12 = vld [vmem:[#allocation5 + $0x48] ss:$16 sps:$4 sm:$0xff]   ;;  %v870_v13 = vld [vmem:[#allocation5 + $0x64] ss:$16 sps:$4 sm:$0xff]  }
  0x3c   :  { %v872_v14 = vld [vmem:[#allocation5 + $0x6c] ss:$16 sps:$4 sm:$0xff]   ;;  %v874_v15 = vld [vmem:[#allocation5 + $0x60] ss:$16 sps:$4 sm:$0xff]   ;;  %v875_v16 = vld [vmem:[#allocation5 + $0x68] ss:$16 sps:$4 sm:$0xff]  }
  0x3d   :  { %v876_v17 = vld [vmem:[#allocation5 + $0x84] ss:$16 sps:$4 sm:$0xff]   ;;  %v878_v18 = vld [vmem:[#allocation5 + $0x8c] ss:$16 sps:$4 sm:$0xff]   ;;  %v880_v19 = vld [vmem:[#allocation5 + $0x80] ss:$16 sps:$4 sm:$0xff]  }
  0x3e   :  { %279 = vmatpush1.bf16.msra.mxu0 %v862_v7  ;;  %320 = vmatpush1.bf16.msra.mxu1 %v863_v8  ;;  %v881_v20 = vld [vmem:[#allocation5 + $0x88] ss:$16 sps:$4 sm:$0xff]   ;;  %v882_v21 = vld [vmem:[#allocation5 + $0xa4] ss:$16 sps:$4 sm:$0xff]   ;;  %v884_v22 = vld [vmem:[#allocation5 + $0xac] ss:$16 sps:$4 sm:$0xff]  }
  0x3f   :  { %280 = vmatprep.subr.bf16.mxu0 %v864_v9  ;;  %321 = vmatprep.subr.bf16.mxu1 %v866_v10  ;;  %v886_v23 = vld [vmem:[#allocation5 + $0xa0] ss:$16 sps:$4 sm:$0xff]   ;;  %v887_v24 = vld [vmem:[#allocation5 + $0xa8] ss:$16 sps:$4 sm:$0xff]   ;;  %v888_v25 = vld [vmem:[#allocation5 + $0xc4] ss:$16 sps:$4 sm:$0xff]  }
  0x40   :  { %v890_v26 = vld [vmem:[#allocation5 + $0xcc] ss:$16 sps:$4 sm:$0xff]   ;;  %v892_v27 = vld [vmem:[#allocation5 + $0xc0] ss:$16 sps:$4 sm:$0xff]   ;;  %v893_v28 = vld [vmem:[#allocation5 + $0xc8] ss:$16 sps:$4 sm:$0xff]  }
  0x41   :  { %v894_v29 = vld [vmem:[#allocation5 + $0xe4] ss:$16 sps:$4 sm:$0xff]   ;;  %v896_v30 = vld [vmem:[#allocation5 + $0xec] ss:$16 sps:$4 sm:$0xff]   ;;  %v898_v31 = vld [vmem:[#allocation5 + $0xe0] ss:$16 sps:$4 sm:$0xff]  }
  0x42   :  { %281 = vmatpush1.bf16.msra.mxu0 %v868_v11  ;;  %322 = vmatpush1.bf16.msra.mxu1 %v869_v12  ;;  %v899_v32 = vld [vmem:[#allocation5 + $0xe8] ss:$16 sps:$4 sm:$0xff]   ;;  %v900_v33 = vld [vmem:[#allocation7 + $0x40] sm:$0xff]   ;;  %v61_v35 = vld [vmem:[#allocation2] sm:$0xf]  ;;  %v97_v3 = vshrl.u32 %v96_v2, 7 }
  0x43   :  { %282 = vmatprep.subr.bf16.mxu0 %v870_v13  ;;  %323 = vmatprep.subr.bf16.mxu1 %v872_v14  ;;  %v901_v34 = vld [vmem:[#allocation7 + $0xc0] sm:$0xff]   ;;  %v905_v39 = vld [vmem:[#allocation7 + $0xc8] sm:$0xff]   ;;  %v908_v42 = vld [vmem:[#allocation7 + $0x50] sm:$0xff]   ;;  %s1034_s8 = smov [#allocation8]  }
  0x44   :  { %v902_v36 = vld [vmem:[#allocation7] sm:$0xff]   ;;  %v906_v40 = vld [vmem:[#allocation7 + $0x8] sm:$0xff]   ;;  %v909_v43 = vld [vmem:[#allocation7 + $0xd0] sm:$0xff]   ;;  %v98_v4 = vsub.s32 0, %v97_v3  ;;  %v106_v5 = vsub.s32 2, %v97_v3  ;;  %v102_v7 = vsub.s32 1, %v97_v3 }
  0x45   :  { %v903_v37 = vld [vmem:[#allocation7 + $0x80] sm:$0xff]   ;;  %v907_v41 = vld [vmem:[#allocation7 + $0x88] sm:$0xff]   ;;  %v910_v44 = vld [vmem:[#allocation7 + $0x10] sm:$0xff]   ;;  %v110_v8 = vsub.s32 3, %v97_v3  ;;  %s724_s9 = sshll.u32 %s1034_s8, 4  ;;  %s725_s9 = int_to_ptr.vmem [resolvable:$true] %s724_s9 }
  0x46   :  { %283 = vmatpush1.bf16.msra.mxu0 %v874_v15  ;;  %324 = vmatpush1.bf16.msra.mxu1 %v875_v16  ;;  %v911_v45 = vld [vmem:[#allocation7 + $0x90] sm:$0xff]   ;;  %v912_v46 = vld [vmem:[#allocation7 + $0x58] sm:$0xff]   ;;  %v916_v50 = vld [vmem:[#allocation7 + $0x60] sm:$0xff]   ;;  %s998_s10 = scalar_lea.vmem %s725_s9, 128  ;;  %p1003_p11 = scmp.lt.s32.totalorder %s725_s9, %s725_s9 }
  0x47   :  { %284 = vmatprep.subr.bf16.mxu0 %v876_v17  ;;  %325 = vmatprep.subr.bf16.mxu1 %v878_v18  ;;  %v913_v47 = vld [vmem:[#allocation7 + $0xd8] sm:$0xff]   ;;  %v917_v51 = vld [vmem:[#allocation7 + $0xe0] sm:$0xff]   ;;  %v920_v54 = vld [vmem:[#allocation7 + $0x68] sm:$0xff]   ;;  %p999_p10 = scmp.ne.s32.totalorder %s725_s9, %s998_s10  ;;  %p1004_p12 = scmp.lt.s32.totalorder %s998_s10, %s998_s10 }
  0x48   :  { %v914_v48 = vld [vmem:[#allocation7 + $0x18] sm:$0xff]   ;;  %v918_v52 = vld [vmem:[#allocation7 + $0x20] sm:$0xff]   ;;  %v921_v55 = vld [vmem:[#allocation7 + $0xe8] sm:$0xff]  }
  0x49   :  { %v915_v49 = vld [vmem:[#allocation7 + $0x98] sm:$0xff]   ;;  %v919_v53 = vld [vmem:[#allocation7 + $0xa0] sm:$0xff]   ;;  %v922_v56 = vld [vmem:[#allocation7 + $0x28] sm:$0xff]   ;;  %p1005_p13 = por %p1004_p12, %p1003_p11 }
  0x4a   :  { %285 = vmatpush1.bf16.msra.mxu0 %v880_v19  ;;  %326 = vmatpush1.bf16.msra.mxu1 %v881_v20  ;;  %v923_v57 = vld [vmem:[#allocation7 + $0xa8] sm:$0xff]   ;;  %v924_v58 = vld [vmem:[#allocation7 + $0x70] sm:$0xff]   ;;  %v928_v62 = vld [vmem:[#allocation7 + $0x78] sm:$0xff]  }
  0x4b   :  { %286 = vmatprep.subr.bf16.mxu0 %v882_v21  ;;  %327 = vmatprep.subr.bf16.mxu1 %v884_v22  ;;  %v925_v59 = vld [vmem:[#allocation7 + $0xf0] sm:$0xff]   ;;  %v929_v63 = vld [vmem:[#allocation7 + $0xf8] sm:$0xff]   ;;  %p1006_p0 = pnand %p1005_p13, %p999_p10 }
  0x4c   :  { %v926_v60 = vld [vmem:[#allocation7 + $0x30] sm:$0xff]   ;;  %v930_v0 = vld [vmem:[#allocation7 + $0x38] sm:$0xff]  }
  0x4d   :  { %v927_v61 = vld [vmem:[#allocation7 + $0xb0] sm:$0xff]   ;;  %v931_v1 = vld [vmem:[#allocation7 + $0xb8] sm:$0xff]  }
  0x4e   :  { %287 = vmatpush1.bf16.msra.mxu0 %v886_v23  ;;  %328 = vmatpush1.bf16.msra.mxu1 %v887_v24  ;;  %v94_v6 = vld [vmem:[%s1121_s2] sm:$0xf] }
  0x4f   :  { %288 = vmatprep.subr.bf16.mxu0 %v888_v25  ;;  %329 = vmatprep.subr.bf16.mxu1 %v890_v26  ;;  %v99_v9 = vrot.slane %v94_v6, %v98_v4  ;;  %v107_v10 = vrot.slane %v94_v6, %v106_v5  ;;  %v103_v11 = vrot.slane %v94_v6, %v102_v7 }
  0x50   :  { %v111_v12 = vrot.slane %v94_v6, %v110_v8 }
  0x52   :  { %289 = vmatpush1.bf16.msra.mxu0 %v892_v27  ;;  %330 = vmatpush1.bf16.msra.mxu1 %v893_v28 }
  0x53   :  { %290 = vmatprep.subr.bf16.mxu0 %v894_v29  ;;  %331 = vmatprep.subr.bf16.mxu1 %v896_v30 }
  0x56   :  { %291 = vmatpush1.bf16.msra.mxu0 %v898_v31  ;;  %332 = vmatpush1.bf16.msra.mxu1 %v899_v32 }
  0x57   :  { %799 = vmatprep.subr.bf16.mxu0 %v900_v33  ;;  %821 = vmatprep.subr.bf16.mxu1 %v901_v34 }
  0x59   :  { %309 = vmatmul.mubr.bf16.vlgmr.msra.gmra.mrb[0].mxu0 %v61_v35  ;;  %350 = vmatmul.mubr.bf16.vlgmr.msra.gmra.mrb[0].mxu1 %v61_v35 }
  0x5a   :  { %800 = vmatpush3.bf16.msra.mxu0 %v902_v36  ;;  %822 = vmatpush3.bf16.msra.mxu1 %v903_v37 }
  0x5b   :  { %801 = vmatprep.subr.bf16.mxu0 %v904_v38  ;;  %823 = vmatprep.subr.bf16.mxu1 %v905_v39  ;;  %v766_v39 = vld [vmem:[%s1123_s4] ss:$0 sm:$0xff] }
  0x5e   :  { %802 = vmatpush3.bf16.msra.mxu0 %v906_v40  ;;  %824 = vmatpush3.bf16.msra.mxu1 %v907_v41 }
  0x5f   :  { %803 = vmatprep.subr.bf16.mxu0 %v908_v42  ;;  %825 = vmatprep.subr.bf16.mxu1 %v909_v43 }
  0x62   :  { %804 = vmatpush3.bf16.msra.mxu0 %v910_v44  ;;  %826 = vmatpush3.bf16.msra.mxu1 %v911_v45 }
  0x63   :  { %805 = vmatprep.subr.bf16.mxu0 %v912_v46  ;;  %827 = vmatprep.subr.bf16.mxu1 %v913_v47 }
  0x66   :  { %806 = vmatpush3.bf16.msra.mxu0 %v914_v48  ;;  %828 = vmatpush3.bf16.msra.mxu1 %v915_v49 }
  0x67   :  { %807 = vmatprep.subr.bf16.mxu0 %v916_v50  ;;  %829 = vmatprep.subr.bf16.mxu1 %v917_v51 }
  0x6a   :  { %808 = vmatpush3.bf16.msra.mxu0 %v918_v52  ;;  %830 = vmatpush3.bf16.msra.mxu1 %v919_v53 }
  0x6b   :  { %809 = vmatprep.subr.bf16.mxu0 %v920_v54  ;;  %831 = vmatprep.subr.bf16.mxu1 %v921_v55 }
  0x6e   :  { %810 = vmatpush3.bf16.msra.mxu0 %v922_v56  ;;  %832 = vmatpush3.bf16.msra.mxu1 %v923_v57 }
  0x6f   :  { %811 = vmatprep.subr.bf16.mxu0 %v924_v58  ;;  %833 = vmatprep.subr.bf16.mxu1 %v925_v59 }
  0x72   :  { %812 = vmatpush3.bf16.msra.mxu0 %v926_v60  ;;  %834 = vmatpush3.bf16.msra.mxu1 %v927_v61 }
  0x73   :  { %813 = vmatprep.subr.bf16.mxu0 %v928_v62  ;;  %835 = vmatprep.subr.bf16.mxu1 %v929_v63 }
  0x76   :  { %814 = vmatpush3.bf16.msra.mxu0 %v930_v0  ;;  %836 = vmatpush3.bf16.msra.mxu1 %v931_v1 }
 0x12c   :  { %v310_v13 = vpop.f32.mrb[0].mxu0  ;;  %v351_v14 = vpop.f32.mrb[0].mxu1 }
 0x12d   :  { %v311_v15 = vadd.f32 %v310_v13, %v99_v9  ;;  %v352_v16 = vadd.f32 %v351_v14, %v107_v10  ;;  %v312_v17 = vpop.f32.mrb[1].mxu0  ;;  %v353_v18 = vpop.f32.mrb[1].mxu1 }
 0x12e   :  { %v313_v19 = vadd.f32 %v312_v17, %v103_v11  ;;  %v354_v20 = vadd.f32 %v353_v18, %v111_v12  ;;  %v314_v21 = vpop.f32.mrb[2].mxu0  ;;  %v355_v22 = vpop.f32.mrb[2].mxu1 }
 0x12f   :  { %vm358_vm0 = vcmp.ge.f32.partialorder %v311_v15, 0.0  ;;  %v362_v23 = vmul.f32 0.1, %v311_v15  ;;  %vm360_vm1 = vcmp.ge.f32.partialorder %v352_v16, 0.0  ;;  %v364_v24 = vmul.f32 0.1, %v352_v16 }
 0x130   :  { %vm359_vm2 = vcmp.ge.f32.partialorder %v313_v19, 0.0  ;;  %v363_v25 = vmul.f32 0.1, %v313_v19  ;;  %vm361_vm3 = vcmp.ge.f32.partialorder %v354_v20, 0.0  ;;  %v365_v26 = vmul.f32 0.1, %v354_v20 }
 0x131   :  { %v366_v27 = vsel %vm358_vm0, %v311_v15, %v362_v23  ;;  %v368_v28 = vsel %vm360_vm1, %v352_v16, %v364_v24  ;;  %v315_v29 = vpop.f32.mrb[3].mxu0  ;;  %v356_v30 = vpop.f32.mrb[3].mxu1 }
 0x132   :  { %v367_v31 = vsel %vm359_vm2, %v313_v19, %v363_v25  ;;  %v369_v32 = vsel %vm361_vm3, %v354_v20, %v365_v26  ;;  %v370_v35 = vpack.c.bf16 %v366_v27, %v366_v27  ;;  %v372_v36 = vpack.c.bf16 %v368_v28, %v368_v28 }
 0x133   :  { %v371_v33 = vpack.c.bf16 %v367_v31, %v367_v31  ;;  %v373_v34 = vpack.c.bf16 %v369_v32, %v369_v32 }
 0x135   :  { %669 = vmatprep.mubr.bf16.mxu0 %v371_v33  ;;  %709 = vmatprep.mubr.bf16.mxu1 %v373_v34 }
 0x136   :  { %670 = vmatmul.mubr.bf16.vlgmr.msra.gmra.mrb[4].mxu0 %v370_v35  ;;  %710 = vmatmul.mubr.bf16.vlgmr.msra.gmra.mrb[4].mxu1 %v372_v36 }
 0x209   :  { %v815_v37 = vpop.f32.mrb[4].mxu0  ;;  %v837_v38 = vpop.f32.mrb[4].mxu1 }
 0x20a   :  { %v816_v40 = vpop.f32.mrb[5].mxu0  ;;  %v838_v41 = vpop.f32.mrb[5].mxu1 }
 0x20b   :  { %v817_v42 = vadd.f32 %v816_v40, %v815_v37  ;;  %v839_v43 = vadd.f32 %v838_v41, %v837_v38  ;;  %v818_v44 = vpop.f32.mrb[6].mxu0  ;;  %v840_v45 = vpop.f32.mrb[6].mxu1 }
 0x20c   :  { %v819_v46 = vpop.f32.mrb[7].mxu0  ;;  %v841_v47 = vpop.f32.mrb[7].mxu1 }
 0x20d   :  { %v672_v48 = vadd.f32 %v817_v42, %v766_v39 }
 0x20f   :  { %v712_v49 = vadd.f32 %v839_v43, %v672_v48 }
 0x211   :  { %717 = vst [vmem:[#allocation8] sm:$0xff] %v712_v49 }
 0x212   :  { %1009 = shalt.err (!%p1006_p0)
}
 0x213   :  { %s1010_s12 = scalar_lea.hbm %s1124_s5, 128 }
 0x214   :  { %p1011_p1 = scmp.ne.s32.totalorder %s1124_s5, %s1010_s12  ;;  %p1014_p2 = scmp.lt.u32.totalorder %s1010_s12, %s1124_s5 }
 0x216   :  { %p1016_p3 = pnand %p1014_p2, %p1011_p1 }
 0x218   :  { %1019 = shalt.err (!%p1016_p3)
}
 0x219   :  { %727 = dma.vmem_to_hbm [thread:$0]  %s725_s9, 128, %s1124_s5, [#allocation4]  }
 0x21a   :  { %1024 = dma.done.wait [#allocation4], 128  }
 0x21b   :  { %1025 = vsyncadd [#allocation4], 4294967168 }
 0x21c   :  { %731 = vsyncpa [#allocation3], 1 }
 0x21d   :  { %732 = vsyncpa [#allocation6], 1 }
 0x21e   :  { %733 = vsyncpa [#allocation4], 1 }

</bundles_post_ra>
